<compile_context>
chip_gen: v5e
topology: v5e:2x2
jax: 0.10.0
libtpu: 0.0.40
codegen_flags: <defaults>
</compile_context>

<pallas_src>
import math

import jax
import jax.numpy as jnp
from jax.experimental import pallas as pl
from jax.experimental.pallas import tpu as pltpu

CTX_LENGTH = 64
D_MODEL = 64
NUM_HEAD = 4
HEAD_SIZE = D_MODEL // NUM_HEAD


def _mha_kernel(x_ref, wqkv_ref, wo_ref, bo_ref, o_ref):
    # x_ref: (B_TILE, T, D) bf16; wqkv_ref: (D, 3*D) bf16; wo_ref: (D, D) bf16; bo_ref: (1, D) f32
    b_tile, T, D = x_ref.shape
    scale = 1.0 / math.sqrt(HEAD_SIZE)

    # Fused QKV projection for the whole block: one MXU matmul with M = B_TILE*T, N = 3*D.
    x2 = x_ref[...].reshape(b_tile * T, D)                                      # bf16
    qkv = jnp.dot(x2, wqkv_ref[...],
                  preferred_element_type=jnp.float32).astype(jnp.bfloat16)      # (bT, 3D)
    qkv3 = qkv.reshape(b_tile, T, 3 * D)

    # Causal additive bias, hoisted out of the head loop (reused NUM_HEAD times).
    row = jax.lax.broadcasted_iota(jnp.int32, (T, T), 0)
    col = jax.lax.broadcasted_iota(jnp.int32, (T, T), 1)
    mask_bias = jnp.where(col <= row, 0.0, -1e30).astype(jnp.float32)[None, :, :]

    wo = wo_ref[...]                                                            # (D, D) bf16
    acc = jnp.zeros((b_tile, T, D), dtype=jnp.float32)
    for h in range(NUM_HEAD):
        lo = h * HEAD_SIZE
        hi = lo + HEAD_SIZE
        q = qkv3[:, :, lo:hi]                                                   # (B_TILE, T, HS)
        k = qkv3[:, :, D + lo:D + hi]                                           # (B_TILE, T, HS)
        v = qkv[:, 2 * D + lo:2 * D + hi]                                       # (B_TILE*T, HS)

        # (attn @ V) @ Wo_h == attn @ (V @ Wo_h): removes the lane-axis concat of head
        # outputs; the Wo row-slice is a sublane slice at a multiple of HEAD_SIZE.
        vW = jnp.dot(v, wo[lo:hi, :], preferred_element_type=jnp.float32)       # (bT, D) f32
        vW = vW.astype(jnp.bfloat16).reshape(b_tile, T, D)

        s = jnp.einsum('bqd,bkd->bqk', q, k,
                       preferred_element_type=jnp.float32) * scale + mask_bias  # (B_TILE, T, T)
        m = jnp.max(s, axis=-1, keepdims=True)
        e = jnp.exp(s - m)                                                      # unnormalized
        inv_denom = pl.reciprocal(jnp.sum(e, axis=-1, keepdims=True), approx=True)

        o_h = jnp.einsum('bqk,bkd->bqd', e.astype(jnp.bfloat16), vW,
                         preferred_element_type=jnp.float32)                    # (B_TILE, T, D)
        # Deferred softmax normalization: scale the (T, D) head output, not the (T, T) weights.
        acc = acc + o_h * inv_denom

    out = acc + bo_ref[...].astype(jnp.float32)                                 # bias broadcast
    # TODO(synk): dropout (p=0.2) on attention weights and output is identity in eval mode.
    o_ref[...] = out.astype(o_ref.dtype)


def multi_head_attention(x, wq, wk, wv, wo, bo, *, b_tile=None):
    """x: (B, T, D_MODEL) f32.
    wq/wk/wv: (D_MODEL, NUM_HEAD*HEAD_SIZE) — per-head weights already transposed to (in, out)
    and stacked along the output dim. wo: (D_MODEL, D_MODEL) transposed. bo: (1, D_MODEL)."""
    B, T, D = x.shape
    assert D == D_MODEL and T <= CTX_LENGTH

    if b_tile is None:
        # Biggest block that comfortably fits VMEM; small batches run in a single grid step.
        b_tile = min(B, 8)
    b_pad = pl.cdiv(B, b_tile) * b_tile

    # bf16 MXU inputs (accumulation stays f32 inside the kernel); fuse QKV weights once.
    x_in = x.astype(jnp.bfloat16)
    if b_pad != B:
        x_in = jnp.pad(x_in, ((0, b_pad - B), (0, 0), (0, 0)))
    w_qkv = jnp.concatenate([wq, wk, wv], axis=-1).astype(jnp.bfloat16)          # (D, 3*D)
    wo_bf = wo.astype(jnp.bfloat16)
    bo_f32 = bo.astype(jnp.float32)

    grid_spec = pltpu.PrefetchScalarGridSpec(
        num_scalar_prefetch=0,
        grid=(b_pad // b_tile,),
        in_specs=[
            pl.BlockSpec((b_tile, T, D), lambda b: (b, 0, 0)),
            pl.BlockSpec((D, 3 * D), lambda b: (0, 0)),
            pl.BlockSpec((D, D), lambda b: (0, 0)),
            pl.BlockSpec((1, D), lambda b: (0, 0)),
        ],
        out_specs=pl.BlockSpec((b_tile, T, D), lambda b: (b, 0, 0)),
    )

    out = pl.pallas_call(
        _mha_kernel,
        out_shape=jax.ShapeDtypeStruct((b_pad, T, D), x.dtype),
        grid_spec=grid_spec,
        compiler_params=pltpu.CompilerParams(dimension_semantics=("parallel",)),
    )(x_in, w_qkv, wo_bf, bo_f32)
    return out[:B] if b_pad != B else out


def _init_params(key):
    """Deterministic init mimicking the PyTorch module's shapes.
    PyTorch Linear stores weight (out, in) and computes x @ W.T; here we store the
    transposed (in, out) form directly, with per-head weights stacked along out."""
    keys = jax.random.split(key, 3 * NUM_HEAD + 2)
    k_idx = 0
    wq_heads, wk_heads, wv_heads = [], [], []
    bound = 1.0 / math.sqrt(D_MODEL)
    for _ in range(NUM_HEAD):
        wq_heads.append(jax.random.uniform(keys[k_idx], (D_MODEL, HEAD_SIZE),
                                           jnp.float32, -bound, bound)); k_idx += 1
        wk_heads.append(jax.random.uniform(keys[k_idx], (D_MODEL, HEAD_SIZE),
                                           jnp.float32, -bound, bound)); k_idx += 1
        wv_heads.append(jax.random.uniform(keys[k_idx], (D_MODEL, HEAD_SIZE),
                                           jnp.float32, -bound, bound)); k_idx += 1
    wq = jnp.concatenate(wq_heads, axis=-1)   # (D_MODEL, NUM_HEAD*HEAD_SIZE)
    wk = jnp.concatenate(wk_heads, axis=-1)
    wv = jnp.concatenate(wv_heads, axis=-1)
    wo = jax.random.uniform(keys[k_idx], (D_MODEL, D_MODEL),
                            jnp.float32, -bound, bound); k_idx += 1
    bo = jax.random.uniform(keys[k_idx], (1, D_MODEL),
                            jnp.float32, -bound, bound)
    return wq, wk, wv, wo, bo


def _reference(x, wq, wk, wv, wo, bo):
    """Pure-JAX f32 reference of the PyTorch forward (eval mode)."""
    B, T, D = x.shape
    Q = x @ wq
    K = x @ wk
    V = x @ wv
    outs = []
    mask = jnp.tril(jnp.ones((T, T), dtype=bool))
    for h in range(NUM_HEAD):
        lo, hi = h * HEAD_SIZE, (h + 1) * HEAD_SIZE
        s = Q[:, :, lo:hi] @ jnp.swapaxes(K[:, :, lo:hi], -1, -2) / math.sqrt(HEAD_SIZE)
        s = jnp.where(mask[None], s, -jnp.inf)
        w = jax.nn.softmax(s, axis=-1)
        outs.append(w @ V[:, :, lo:hi])
    cat = jnp.concatenate(outs, axis=-1)
    return cat @ wo + bo[0]


if __name__ == "__main__":
    key = jax.random.PRNGKey(0)
    k_x, k_p, k_x2, k_x3 = jax.random.split(key, 4)
    wq, wk, wv, wo, bo = _init_params(k_p)

    # bf16 MXU inputs => compare to the f32 reference with a correspondingly loose tolerance.
    TOL = dict(atol=5e-2, rtol=5e-2)

    # Small shape (single grid step).
    x = jax.random.normal(k_x, (2, 8, D_MODEL), dtype=jnp.float32)
    out = jax.block_until_ready(multi_head_attention(x, wq, wk, wv, wo, bo))
    ref = _reference(x, wq, wk, wv, wo, bo)
    assert out.shape == x.shape
    assert jnp.allclose(out, ref, **TOL)

    # Full context length (exercises the full (64, 64) causal mask).
    x2 = jax.random.normal(k_x2, (8, CTX_LENGTH, D_MODEL), dtype=jnp.float32)
    out2 = jax.block_until_ready(multi_head_attention(x2, wq, wk, wv, wo, bo))
    ref2 = _reference(x2, wq, wk, wv, wo, bo)
    assert jnp.allclose(out2, ref2, **TOL)

    # Odd batch larger than the tile (exercises batch padding + multi-step grid + trim).
    x3 = jax.random.normal(k_x3, (11, 16, D_MODEL), dtype=jnp.float32)
    out3 = jax.block_until_ready(multi_head_attention(x3, wq, wk, wv, wo, bo))
    ref3 = _reference(x3, wq, wk, wv, wo, bo)
    assert jnp.allclose(out3, ref3, **TOL)

    print("KERNEL_OK")
</pallas_src>

<mosaic_0001>
module attributes {stable_mosaic.version = 11 : i64} {
  func.func @_mha_kernel(%arg0: i32, %arg1: memref<2x8x64xbf16, #tpu.memory_space<vmem>>, %arg2: memref<64x192xbf16, #tpu.memory_space<vmem>>, %arg3: memref<64x64xbf16, #tpu.memory_space<vmem>>, %arg4: memref<1x64xf32, #tpu.memory_space<vmem>>, %arg5: memref<2x8x64xf32, #tpu.memory_space<vmem>>) attributes {dimension_semantics = [#tpu.dimension_semantics<parallel>], iteration_bounds = array<i64: 1>, scalar_prefetch = 0 : i64, scratch_operands = 0 : i64, tpu.core_type = #tpu.core_type<tc>, window_params = [{transform_indices = @transform_0, window_bounds = array<i64: 2, 8, 64>}, {pipeline_mode = #tpu.pipeline_mode<synchronous>, transform_indices = @transform_1, window_bounds = array<i64: 64, 192>}, {pipeline_mode = #tpu.pipeline_mode<synchronous>, transform_indices = @transform_2, window_bounds = array<i64: 64, 64>}, {pipeline_mode = #tpu.pipeline_mode<synchronous>, transform_indices = @transform_3, window_bounds = array<i64: 1, 64>}, {transform_indices = @transform_4, window_bounds = array<i64: 2, 8, 64>}]} {
    %c0 = arith.constant 0 : index
    %c0_0 = arith.constant 0 : index
    %c0_1 = arith.constant 0 : index
    %0 = vector.load %arg1[%c0, %c0_0, %c0_1] : memref<2x8x64xbf16, #tpu.memory_space<vmem>>, vector<2x8x64xbf16>
    %1 = vector.shape_cast %0 : vector<2x8x64xbf16> to vector<16x64xbf16>
    %c0_2 = arith.constant 0 : index
    %c0_3 = arith.constant 0 : index
    %2 = vector.load %arg2[%c0_2, %c0_3] : memref<64x192xbf16, #tpu.memory_space<vmem>>, vector<64x192xbf16>
    %cst = arith.constant dense<0.000000e+00> : vector<16x192xf32>
    %3 = tpu.matmul %1, %2, %cst {dimension_numbers = #tpu.dot_dimension_numbers<[1], [0], [0], [1], [0, 0, 1, 1], [], []>} : vector<16x64xbf16>, vector<64x192xbf16>, vector<16x192xf32> -> vector<16x192xf32>
    %4 = arith.truncf %3 : vector<16x192xf32> to vector<16x192xbf16>
    %5 = vector.shape_cast %4 : vector<16x192xbf16> to vector<2x8x192xbf16>
    %6 = tpu.iota {dimensions = array<i32: 0>} : vector<8x8xi32>
    %7 = tpu.iota {dimensions = array<i32: 1>} : vector<8x8xi32>
    %8 = arith.cmpi sle, %7, %6 : vector<8x8xi32>
    %cst_4 = arith.constant 0.000000e+00 : f32
    %cst_5 = arith.constant -1.000000e+30 : f32
    %9 = vector.broadcast %cst_4 : f32 to vector<8x8xf32>
    %10 = vector.broadcast %cst_5 : f32 to vector<8x8xf32>
    %11 = arith.select %8, %9, %10 : vector<8x8xi1>, vector<8x8xf32>
    %12 = vector.shape_cast %11 : vector<8x8xf32> to vector<1x8x8xf32>
    %c0_6 = arith.constant 0 : index
    %c0_7 = arith.constant 0 : index
    %13 = vector.load %arg3[%c0_6, %c0_7] : memref<64x64xbf16, #tpu.memory_space<vmem>>, vector<64x64xbf16>
    %cst_8 = arith.constant 0.000000e+00 : f32
    %14 = vector.broadcast %cst_8 : f32 to vector<2x8x64xf32>
    %15 = vector.extract_strided_slice %5 {offsets = [0, 0, 0], sizes = [2, 8, 16], strides = [1, 1, 1]} : vector<2x8x192xbf16> to vector<2x8x16xbf16>
    %16 = vector.extract_strided_slice %5 {offsets = [0, 0, 64], sizes = [2, 8, 16], strides = [1, 1, 1]} : vector<2x8x192xbf16> to vector<2x8x16xbf16>
    %17 = vector.extract_strided_slice %4 {offsets = [0, 128], sizes = [16, 16], strides = [1, 1]} : vector<16x192xbf16> to vector<16x16xbf16>
    %18 = vector.extract_strided_slice %13 {offsets = [0, 0], sizes = [16, 64], strides = [1, 1]} : vector<64x64xbf16> to vector<16x64xbf16>
    %cst_9 = arith.constant dense<0.000000e+00> : vector<16x64xf32>
    %19 = tpu.matmul %17, %18, %cst_9 {dimension_numbers = #tpu.dot_dimension_numbers<[1], [0], [0], [1], [0, 0, 1, 1], [], []>} : vector<16x16xbf16>, vector<16x64xbf16>, vector<16x64xf32> -> vector<16x64xf32>
    %20 = arith.truncf %19 : vector<16x64xf32> to vector<16x64xbf16>
    %21 = vector.shape_cast %20 : vector<16x64xbf16> to vector<2x8x64xbf16>
    "tpu.trace_start"() <{level = 10 : i32, message = "bqd,bkd->bqk"}> : () -> ()
    %cst_10 = arith.constant dense<0.000000e+00> : vector<2x8x8xf32>
    %22 = tpu.matmul %15, %16, %cst_10 {dimension_numbers = #tpu.dot_dimension_numbers<[2], [2], [1], [1], [0, 0, 0, 1, 1, 1], [0], [0]>} : vector<2x8x16xbf16>, vector<2x8x16xbf16>, vector<2x8x8xf32> -> vector<2x8x8xf32>
    "tpu.trace_stop"() : () -> ()
    %cst_11 = arith.constant 2.500000e-01 : f32
    %23 = vector.broadcast %cst_11 : f32 to vector<2x8x8xf32>
    %24 = arith.mulf %22, %23 : vector<2x8x8xf32>
    %25 = vector.broadcast %12 : vector<1x8x8xf32> to vector<2x8x8xf32>
    %26 = arith.addf %24, %25 : vector<2x8x8xf32>
    %cst_12 = arith.constant dense<0xFF800000> : vector<2x8xf32>
    %27 = vector.multi_reduction <maximumf>, %26, %cst_12 [2] : vector<2x8x8xf32> to vector<2x8xf32>
    %28 = vector.shape_cast %27 : vector<2x8xf32> to vector<2x8x1xf32>
    %29 = vector.broadcast %28 : vector<2x8x1xf32> to vector<2x8x8xf32>
    %30 = arith.subf %26, %29 : vector<2x8x8xf32>
    %31 = math.exp %30 : vector<2x8x8xf32>
    %cst_13 = arith.constant dense<0.000000e+00> : vector<2x8xf32>
    %32 = vector.multi_reduction <add>, %31, %cst_13 [2] : vector<2x8x8xf32> to vector<2x8xf32>
    %33 = vector.shape_cast %32 : vector<2x8xf32> to vector<2x8x1xf32>
    %34 = tpu.reciprocal %33 {approx = true} : vector<2x8x1xf32> -> vector<2x8x1xf32>
    %35 = arith.truncf %31 : vector<2x8x8xf32> to vector<2x8x8xbf16>
    "tpu.trace_start"() <{level = 10 : i32, message = "bqk,bkd->bqd"}> : () -> ()
    %cst_14 = arith.constant dense<0.000000e+00> : vector<2x8x64xf32>
    %36 = tpu.matmul %35, %21, %cst_14 {dimension_numbers = #tpu.dot_dimension_numbers<[2], [1], [1], [2], [0, 0, 0, 1, 1, 2], [0], [0]>} : vector<2x8x8xbf16>, vector<2x8x64xbf16>, vector<2x8x64xf32> -> vector<2x8x64xf32>
    "tpu.trace_stop"() : () -> ()
    %37 = vector.broadcast %34 : vector<2x8x1xf32> to vector<2x8x64xf32>
    %38 = arith.mulf %36, %37 : vector<2x8x64xf32>
    %39 = arith.addf %14, %38 : vector<2x8x64xf32>
    %40 = vector.extract_strided_slice %5 {offsets = [0, 0, 16], sizes = [2, 8, 16], strides = [1, 1, 1]} : vector<2x8x192xbf16> to vector<2x8x16xbf16>
    %41 = vector.extract_strided_slice %5 {offsets = [0, 0, 80], sizes = [2, 8, 16], strides = [1, 1, 1]} : vector<2x8x192xbf16> to vector<2x8x16xbf16>
    %42 = vector.extract_strided_slice %4 {offsets = [0, 144], sizes = [16, 16], strides = [1, 1]} : vector<16x192xbf16> to vector<16x16xbf16>
    %43 = vector.extract_strided_slice %13 {offsets = [16, 0], sizes = [16, 64], strides = [1, 1]} : vector<64x64xbf16> to vector<16x64xbf16>
    %cst_15 = arith.constant dense<0.000000e+00> : vector<16x64xf32>
    %44 = tpu.matmul %42, %43, %cst_15 {dimension_numbers = #tpu.dot_dimension_numbers<[1], [0], [0], [1], [0, 0, 1, 1], [], []>} : vector<16x16xbf16>, vector<16x64xbf16>, vector<16x64xf32> -> vector<16x64xf32>
    %45 = arith.truncf %44 : vector<16x64xf32> to vector<16x64xbf16>
    %46 = vector.shape_cast %45 : vector<16x64xbf16> to vector<2x8x64xbf16>
    "tpu.trace_start"() <{level = 10 : i32, message = "bqd,bkd->bqk"}> : () -> ()
    %cst_16 = arith.constant dense<0.000000e+00> : vector<2x8x8xf32>
    %47 = tpu.matmul %40, %41, %cst_16 {dimension_numbers = #tpu.dot_dimension_numbers<[2], [2], [1], [1], [0, 0, 0, 1, 1, 1], [0], [0]>} : vector<2x8x16xbf16>, vector<2x8x16xbf16>, vector<2x8x8xf32> -> vector<2x8x8xf32>
    "tpu.trace_stop"() : () -> ()
    %cst_17 = arith.constant 2.500000e-01 : f32
    %48 = vector.broadcast %cst_17 : f32 to vector<2x8x8xf32>
    %49 = arith.mulf %47, %48 : vector<2x8x8xf32>
    %50 = vector.broadcast %12 : vector<1x8x8xf32> to vector<2x8x8xf32>
    %51 = arith.addf %49, %50 : vector<2x8x8xf32>
    %cst_18 = arith.constant dense<0xFF800000> : vector<2x8xf32>
    %52 = vector.multi_reduction <maximumf>, %51, %cst_18 [2] : vector<2x8x8xf32> to vector<2x8xf32>
    %53 = vector.shape_cast %52 : vector<2x8xf32> to vector<2x8x1xf32>
    %54 = vector.broadcast %53 : vector<2x8x1xf32> to vector<2x8x8xf32>
    %55 = arith.subf %51, %54 : vector<2x8x8xf32>
    %56 = math.exp %55 : vector<2x8x8xf32>
    %cst_19 = arith.constant dense<0.000000e+00> : vector<2x8xf32>
    %57 = vector.multi_reduction <add>, %56, %cst_19 [2] : vector<2x8x8xf32> to vector<2x8xf32>
    %58 = vector.shape_cast %57 : vector<2x8xf32> to vector<2x8x1xf32>
    %59 = tpu.reciprocal %58 {approx = true} : vector<2x8x1xf32> -> vector<2x8x1xf32>
    %60 = arith.truncf %56 : vector<2x8x8xf32> to vector<2x8x8xbf16>
    "tpu.trace_start"() <{level = 10 : i32, message = "bqk,bkd->bqd"}> : () -> ()
    %cst_20 = arith.constant dense<0.000000e+00> : vector<2x8x64xf32>
    %61 = tpu.matmul %60, %46, %cst_20 {dimension_numbers = #tpu.dot_dimension_numbers<[2], [1], [1], [2], [0, 0, 0, 1, 1, 2], [0], [0]>} : vector<2x8x8xbf16>, vector<2x8x64xbf16>, vector<2x8x64xf32> -> vector<2x8x64xf32>
    "tpu.trace_stop"() : () -> ()
    %62 = vector.broadcast %59 : vector<2x8x1xf32> to vector<2x8x64xf32>
    %63 = arith.mulf %61, %62 : vector<2x8x64xf32>
    %64 = arith.addf %39, %63 : vector<2x8x64xf32>
    %65 = vector.extract_strided_slice %5 {offsets = [0, 0, 32], sizes = [2, 8, 16], strides = [1, 1, 1]} : vector<2x8x192xbf16> to vector<2x8x16xbf16>
    %66 = vector.extract_strided_slice %5 {offsets = [0, 0, 96], sizes = [2, 8, 16], strides = [1, 1, 1]} : vector<2x8x192xbf16> to vector<2x8x16xbf16>
    %67 = vector.extract_strided_slice %4 {offsets = [0, 160], sizes = [16, 16], strides = [1, 1]} : vector<16x192xbf16> to vector<16x16xbf16>
    %68 = vector.extract_strided_slice %13 {offsets = [32, 0], sizes = [16, 64], strides = [1, 1]} : vector<64x64xbf16> to vector<16x64xbf16>
    %cst_21 = arith.constant dense<0.000000e+00> : vector<16x64xf32>
    %69 = tpu.matmul %67, %68, %cst_21 {dimension_numbers = #tpu.dot_dimension_numbers<[1], [0], [0], [1], [0, 0, 1, 1], [], []>} : vector<16x16xbf16>, vector<16x64xbf16>, vector<16x64xf32> -> vector<16x64xf32>
    %70 = arith.truncf %69 : vector<16x64xf32> to vector<16x64xbf16>
    %71 = vector.shape_cast %70 : vector<16x64xbf16> to vector<2x8x64xbf16>
    "tpu.trace_start"() <{level = 10 : i32, message = "bqd,bkd->bqk"}> : () -> ()
    %cst_22 = arith.constant dense<0.000000e+00> : vector<2x8x8xf32>
    %72 = tpu.matmul %65, %66, %cst_22 {dimension_numbers = #tpu.dot_dimension_numbers<[2], [2], [1], [1], [0, 0, 0, 1, 1, 1], [0], [0]>} : vector<2x8x16xbf16>, vector<2x8x16xbf16>, vector<2x8x8xf32> -> vector<2x8x8xf32>
    "tpu.trace_stop"() : () -> ()
    %cst_23 = arith.constant 2.500000e-01 : f32
    %73 = vector.broadcast %cst_23 : f32 to vector<2x8x8xf32>
    %74 = arith.mulf %72, %73 : vector<2x8x8xf32>
    %75 = vector.broadcast %12 : vector<1x8x8xf32> to vector<2x8x8xf32>
    %76 = arith.addf %74, %75 : vector<2x8x8xf32>
    %cst_24 = arith.constant dense<0xFF800000> : vector<2x8xf32>
    %77 = vector.multi_reduction <maximumf>, %76, %cst_24 [2] : vector<2x8x8xf32> to vector<2x8xf32>
    %78 = vector.shape_cast %77 : vector<2x8xf32> to vector<2x8x1xf32>
    %79 = vector.broadcast %78 : vector<2x8x1xf32> to vector<2x8x8xf32>
    %80 = arith.subf %76, %79 : vector<2x8x8xf32>
    %81 = math.exp %80 : vector<2x8x8xf32>
    %cst_25 = arith.constant dense<0.000000e+00> : vector<2x8xf32>
    %82 = vector.multi_reduction <add>, %81, %cst_25 [2] : vector<2x8x8xf32> to vector<2x8xf32>
    %83 = vector.shape_cast %82 : vector<2x8xf32> to vector<2x8x1xf32>
    %84 = tpu.reciprocal %83 {approx = true} : vector<2x8x1xf32> -> vector<2x8x1xf32>
    %85 = arith.truncf %81 : vector<2x8x8xf32> to vector<2x8x8xbf16>
    "tpu.trace_start"() <{level = 10 : i32, message = "bqk,bkd->bqd"}> : () -> ()
    %cst_26 = arith.constant dense<0.000000e+00> : vector<2x8x64xf32>
    %86 = tpu.matmul %85, %71, %cst_26 {dimension_numbers = #tpu.dot_dimension_numbers<[2], [1], [1], [2], [0, 0, 0, 1, 1, 2], [0], [0]>} : vector<2x8x8xbf16>, vector<2x8x64xbf16>, vector<2x8x64xf32> -> vector<2x8x64xf32>
    "tpu.trace_stop"() : () -> ()
    %87 = vector.broadcast %84 : vector<2x8x1xf32> to vector<2x8x64xf32>
    %88 = arith.mulf %86, %87 : vector<2x8x64xf32>
    %89 = arith.addf %64, %88 : vector<2x8x64xf32>
    %90 = vector.extract_strided_slice %5 {offsets = [0, 0, 48], sizes = [2, 8, 16], strides = [1, 1, 1]} : vector<2x8x192xbf16> to vector<2x8x16xbf16>
    %91 = vector.extract_strided_slice %5 {offsets = [0, 0, 112], sizes = [2, 8, 16], strides = [1, 1, 1]} : vector<2x8x192xbf16> to vector<2x8x16xbf16>
    %92 = vector.extract_strided_slice %4 {offsets = [0, 176], sizes = [16, 16], strides = [1, 1]} : vector<16x192xbf16> to vector<16x16xbf16>
    %93 = vector.extract_strided_slice %13 {offsets = [48, 0], sizes = [16, 64], strides = [1, 1]} : vector<64x64xbf16> to vector<16x64xbf16>
    %cst_27 = arith.constant dense<0.000000e+00> : vector<16x64xf32>
    %94 = tpu.matmul %92, %93, %cst_27 {dimension_numbers = #tpu.dot_dimension_numbers<[1], [0], [0], [1], [0, 0, 1, 1], [], []>} : vector<16x16xbf16>, vector<16x64xbf16>, vector<16x64xf32> -> vector<16x64xf32>
    %95 = arith.truncf %94 : vector<16x64xf32> to vector<16x64xbf16>
    %96 = vector.shape_cast %95 : vector<16x64xbf16> to vector<2x8x64xbf16>
    "tpu.trace_start"() <{level = 10 : i32, message = "bqd,bkd->bqk"}> : () -> ()
    %cst_28 = arith.constant dense<0.000000e+00> : vector<2x8x8xf32>
    %97 = tpu.matmul %90, %91, %cst_28 {dimension_numbers = #tpu.dot_dimension_numbers<[2], [2], [1], [1], [0, 0, 0, 1, 1, 1], [0], [0]>} : vector<2x8x16xbf16>, vector<2x8x16xbf16>, vector<2x8x8xf32> -> vector<2x8x8xf32>
    "tpu.trace_stop"() : () -> ()
    %cst_29 = arith.constant 2.500000e-01 : f32
    %98 = vector.broadcast %cst_29 : f32 to vector<2x8x8xf32>
    %99 = arith.mulf %97, %98 : vector<2x8x8xf32>
    %100 = vector.broadcast %12 : vector<1x8x8xf32> to vector<2x8x8xf32>
    %101 = arith.addf %99, %100 : vector<2x8x8xf32>
    %cst_30 = arith.constant dense<0xFF800000> : vector<2x8xf32>
    %102 = vector.multi_reduction <maximumf>, %101, %cst_30 [2] : vector<2x8x8xf32> to vector<2x8xf32>
    %103 = vector.shape_cast %102 : vector<2x8xf32> to vector<2x8x1xf32>
    %104 = vector.broadcast %103 : vector<2x8x1xf32> to vector<2x8x8xf32>
    %105 = arith.subf %101, %104 : vector<2x8x8xf32>
    %106 = math.exp %105 : vector<2x8x8xf32>
    %cst_31 = arith.constant dense<0.000000e+00> : vector<2x8xf32>
    %107 = vector.multi_reduction <add>, %106, %cst_31 [2] : vector<2x8x8xf32> to vector<2x8xf32>
    %108 = vector.shape_cast %107 : vector<2x8xf32> to vector<2x8x1xf32>
    %109 = tpu.reciprocal %108 {approx = true} : vector<2x8x1xf32> -> vector<2x8x1xf32>
    %110 = arith.truncf %106 : vector<2x8x8xf32> to vector<2x8x8xbf16>
    "tpu.trace_start"() <{level = 10 : i32, message = "bqk,bkd->bqd"}> : () -> ()
    %cst_32 = arith.constant dense<0.000000e+00> : vector<2x8x64xf32>
    %111 = tpu.matmul %110, %96, %cst_32 {dimension_numbers = #tpu.dot_dimension_numbers<[2], [1], [1], [2], [0, 0, 0, 1, 1, 2], [0], [0]>} : vector<2x8x8xbf16>, vector<2x8x64xbf16>, vector<2x8x64xf32> -> vector<2x8x64xf32>
    "tpu.trace_stop"() : () -> ()
    %112 = vector.broadcast %109 : vector<2x8x1xf32> to vector<2x8x64xf32>
    %113 = arith.mulf %111, %112 : vector<2x8x64xf32>
    %114 = arith.addf %89, %113 : vector<2x8x64xf32>
    %c0_33 = arith.constant 0 : index
    %c0_34 = arith.constant 0 : index
    %115 = vector.load %arg4[%c0_33, %c0_34] : memref<1x64xf32, #tpu.memory_space<vmem>>, vector<1x64xf32>
    %116 = vector.shape_cast %115 : vector<1x64xf32> to vector<1x1x64xf32>
    %117 = vector.broadcast %116 : vector<1x1x64xf32> to vector<2x8x64xf32>
    %118 = arith.addf %114, %117 : vector<2x8x64xf32>
    %c0_35 = arith.constant 0 : index
    %c0_36 = arith.constant 0 : index
    %c0_37 = arith.constant 0 : index
    %119 = vector.load %arg5[%c0_35, %c0_36, %c0_37] : memref<2x8x64xf32, #tpu.memory_space<vmem>>, vector<2x8x64xf32>
    tpu.vector_store %arg5[%c0_35, %c0_36, %c0_37], %118 {strides = array<i32>} : memref<2x8x64xf32, #tpu.memory_space<vmem>>, vector<2x8x64xf32>,
    return
  }
  func.func @transform_0(%arg0: i32) -> (i32, i32, i32) {
    %c0_i32 = arith.constant 0 : i32
    %c0_i32_0 = arith.constant 0 : i32
    %c0_i32_1 = arith.constant 0 : i32
    return %arg0, %c0_i32, %c0_i32_0 : i32, i32, i32
  }
  func.func @transform_1(%arg0: i32) -> (i32, i32) {
    %c0_i32 = arith.constant 0 : i32
    %c0_i32_0 = arith.constant 0 : i32
    %c0_i32_1 = arith.constant 0 : i32
    return %c0_i32, %c0_i32_0 : i32, i32
  }
  func.func @transform_2(%arg0: i32) -> (i32, i32) {
    %c0_i32 = arith.constant 0 : i32
    %c0_i32_0 = arith.constant 0 : i32
    %c0_i32_1 = arith.constant 0 : i32
    return %c0_i32, %c0_i32_0 : i32, i32
  }
  func.func @transform_3(%arg0: i32) -> (i32, i32) {
    %c0_i32 = arith.constant 0 : i32
    %c0_i32_0 = arith.constant 0 : i32
    %c0_i32_1 = arith.constant 0 : i32
    return %c0_i32, %c0_i32_0 : i32, i32
  }
  func.func @transform_4(%arg0: i32) -> (i32, i32, i32) {
    %c0_i32 = arith.constant 0 : i32
    %c0_i32_0 = arith.constant 0 : i32
    %c0_i32_1 = arith.constant 0 : i32
    return %arg0, %c0_i32, %c0_i32_0 : i32, i32, i32
  }
}

</mosaic_0001>

<bundles_post_ra>
// kernel: tpu_custom_call.1
= control target key start
LH: loop header
LB: loop body
LE: loop exit
PB: predicated region body
PF: predicated region fallthrough
CT: control target
= control target key end

     0   :  { %9 = vsyncpa [#allocation3], 0  ;;  %s1206_s0 = inlined_call_operand.hbm [shape: bf16[2,8,64], index: 0, kind: input, shape index: {}]   ;;  %s1207_s1 = inlined_call_operand.hbm [shape: bf16[64,192], index: 1, kind: input, shape index: {}]   ;;  %s1208_s2 = inlined_call_operand.hbm [shape: bf16[64,64], index: 2, kind: input, shape index: {}]   ;;  %s1209_s3 = inlined_call_operand.vmem [shape: f32[1,64], index: 3, kind: input, shape index: {}]   ;;  %s1210_s4 = inlined_call_operand.hbm [shape: f32[2,8,64], index: 4, kind: output, shape index: {}]  }
   0x1   :  { %10 = vsyncpa [#allocation6], 0  ;;  %s29_s17 = sshll.u32 %s1207_s1, 4  ;;  %s30_s17 = int_to_ptr.hbm [resolvable:$true] %s29_s17 }
   0x2   :  { %11 = vsyncpa [#allocation4], 0  ;;  %s1004_s18 = smov [#allocation5]   ;;  %s16_s22 = sshll.u32 %s1206_s0, 4  ;;  %s17_s22 = int_to_ptr.hbm [resolvable:$true] %s16_s22 }
   0x3   :  { %s31_s19 = sshll.u32 %s1004_s18, 4  ;;  %s1005_s23 = smov 128   ;;  %s32_s19 = int_to_ptr.vmem [resolvable:$true] %s31_s19 }
   0x4   :  { %s1006_s24 = smov 8   ;;  %s1007_s25 = smov [#allocation2]  }
   0x5   :  { %37 = dma.hbm_to_vmem [thread:$0]  %s30_s17, 1024, %s32_s19, [#allocation6], %s1005_s23, %s1005_s23, %s1006_s24  }
   0x6   :  { %s18_s26 = sshll.u32 %s1007_s25, 4  ;;  %s1008_s1 = smov 64   ;;  %s19_s26 = int_to_ptr.vmem [resolvable:$true] %s18_s26 }
   0x7   :  { %s1009_s27 = smov 4   ;;  %s42_s30 = sshll.u32 %s1208_s2, 4  ;;  %s43_s30 = int_to_ptr.hbm [resolvable:$true] %s42_s30 }
   0x8   :  { %24 = dma.hbm_to_vmem [thread:$0]  %s17_s22, 128, %s19_s26, [#allocation3], %s1008_s1, %s1008_s1, %s1009_s27  }
   0x9   :  { %s1010_s0 = smov [#allocation7]  }
   0xa   :  { %s44_s5 = sshll.u32 %s1010_s0, 4  ;;  %s45_s5 = int_to_ptr.vmem [resolvable:$true] %s44_s5 }
   0xb   :  { %50 = dma.hbm_to_vmem [thread:$0]  %s43_s30, 512, %s45_s5, [#allocation6], %s1008_s1, %s1008_s1, %s1009_s27  }
   0xc   :  { %998 = dma.done.wait [#allocation3], 128  }
   0xd   :  { %999 = vsyncadd [#allocation3], 4294967168 }
   0xe   :  { %1000 = dma.done.wait [#allocation6], 1536  }
   0xf   :  { %1001 = vsyncadd [#allocation6], 4294965760  ;;  %v797_v0 = vld [vmem:[#allocation5 + $0x30] sm:$0xf]  ;;  %v849_v1 = vld [vmem:[#allocation5 + $0x34] sm:$0xf0]  ;;  %v155_v61 = vlaneseq }
  0x10   :  { %v848_v2 = vld [vmem:[#allocation5 + $0x34] sm:$0xf]  ;;  %v798_v3 = vor.u32 %v849_v1, %v797_v0  ;;  %v799_v4 = vld [vmem:[#allocation5 + $0x38] sm:$0xf0]  ;;  %v789_v5 = vld [vmem:[#allocation5 + $0x20] sm:$0xf] }
  0x11   :  { %v847_v6 = vld [vmem:[#allocation5 + $0x24] sm:$0xf0]  ;;  %v802_v7 = vor.u32 %v848_v2, %v799_v4  ;;  %v846_v8 = vld [vmem:[#allocation5 + $0x24] sm:$0xf]  ;;  %v791_v9 = vld [vmem:[#allocation5 + $0x28] sm:$0xf0] }
  0x12   :  { %129 = vmatpush.bf16.msra.mxu0 %v798_v3  ;;  %v790_v10 = vor.u32 %v847_v6, %v789_v5  ;;  %v794_v11 = vor.u32 %v846_v8, %v791_v9  ;;  %v781_v12 = vld [vmem:[#allocation5 + $0x10] sm:$0xf]  ;;  %v845_v13 = vld [vmem:[#allocation5 + $0x14] sm:$0xf0]  ;;  %v844_v14 = vld [vmem:[#allocation5 + $0x14] sm:$0xf] }
  0x13   :  { %143 = vmatpush.bf16.msra.mxu1 %v802_v7  ;;  %v783_v15 = vld [vmem:[#allocation5 + $0x18] sm:$0xf0]  ;;  %v782_v16 = vor.u32 %v845_v13, %v781_v12  ;;  %v773_v18 = vld [vmem:[#allocation5] sm:$0xf]  ;;  %v843_v19 = vld [vmem:[#allocation5 + $0x4] sm:$0xf0] }
  0x14   :  { %v786_v17 = vor.u32 %v844_v14, %v783_v15  ;;  %v842_v20 = vld [vmem:[#allocation5 + $0x4] sm:$0xf]  ;;  %v775_v21 = vld [vmem:[#allocation5 + $0x8] sm:$0xf0]  ;;  %v774_v22 = vor.u32 %v843_v19, %v773_v18  ;;  %v841_v24 = vld [vmem:[#allocation2] sm:$0xff]  ;;  %vm121_vm0 = vcmask 523264  }
  0x15   :  { %v778_v23 = vor.u32 %v842_v20, %v775_v21  ;;  %v850_v25 = vld [vmem:[#allocation7] sm:$0xff]  ;;  %vm180_vm1 = vcmask 130048   ;;  %s1011_s2 = smov 48   ;;  %s1012_s6 = smov 112   ;;  %v851_v39 = vld [vmem:[#allocation7 + $0x8] sm:$0xff]  ;;  %v852_v48 = vld [vmem:[#allocation7 + $0x10] sm:$0xff] }
  0x16   :  { %130 = vmatpush.bf16.msra.mxu0 %v790_v10  ;;  %191 = vmatpush.bf16.msra.mxu2 %v850_v25  ;;  %s1013_s7 = smov 32   ;;  %s1014_s8 = smov 96   ;;  %vm276_vm2 = vcmask 1043456   ;;  %v156_v62 = vshrl.u32 %v155_v61, 7  ;;  %v158_v63 = vand.u32 127, %v155_v61  ;;  %vm250_vm4 = vcmask 64512  }
  0x17   :  { %144 = vmatpush.bf16.msra.mxu1 %v794_v11  ;;  %v1015_v4 = vmov -1e+30   ;;  %s1016_s9 = smov 16   ;;  %s1017_s10 = smov 80  }
  0x18   :  { %vm159_vm3 = vcmp.le.s32.totalorder %v158_v63, %v156_v62  ;;  %s753_s16 = sshll.u32 %s1210_s4, 4  ;;  %s754_s16 = int_to_ptr.hbm [resolvable:$true] %s753_s16 }
  0x19   :  { %v1103_v5 = vsel %vm159_vm3, 0.0, %v1015_v4 }
  0x1a   :  { %131 = vmatpush.bf16.msra.mxu0 %v782_v16 }
  0x1b   :  { %145 = vmatpush.bf16.msra.mxu1 %v786_v17 }
  0x1e   :  { %132 = vmatpush.bf16.msra.mxu0 %v774_v22 }
  0x1f   :  { %146 = vmatpush.bf16.msra.mxu1 %v778_v23 }
  0x21   :  { %803 = vmatmul.msk.bf16.vlgmr.msra.gmra.mxu0 %vm121_vm0, %v841_v24 }
  0x22   :  { %804 = vmatmul.msk.bf16.vlgmr.msra.gmra.mxu1 %vm121_vm0, %v841_v24 }
  0x23   :  { %334 = vmatpush.bf16.msrb.mxu1 %v851_v39 }
  0x9e   :  { %v134_v26 = vpop.f32.mrf.mxu0 }
  0x9f   :  { %v148_v27 = vpop.f32.mrf.mxu1 }
  0xa0   :  { %v153_v28 = vpack.c.bf16 %v148_v27, %v134_v26 }
  0xa2   :  { %v200_v29 = vunpack.c.l.b16 %v153_v28  ;;  %v171_v34 = vunpack.c.h.b16 %v153_v28 }
  0xa4   :  { %v1062_v30 = vpack.c.b16 %v200_v29, %v200_v29 }
  0xa6   :  { %202 = vrot.lane.b32.xlu0 %v1062_v30, %s1008_s1  ;;  %v136_v31 = vpop.f32.mrf.mxu0 }
  0xa7   :  { %v150_v32 = vpop.f32.mrf.mxu1 }
  0xa8   :  { %v154_v33 = vpack.c.bf16 %v150_v32, %v136_v31 }
  0xaa   :  { %v172_v35 = vunpack.c.h.b16 %v154_v33  ;;  %v223_v36 = vunpack.c.l.b16 %v154_v33 }
  0xac   :  { %v1066_v37 = vpack.c.b16 %v172_v35, %v171_v34  ;;  %v1068_v38 = vpack.c.b16 %v223_v36, %v223_v36 }
  0xae   :  { %368 = vrot.lane.b32.xlu2 %v1068_v38, %s1011_s2  ;;  %225 = vrot.lane.b32.xlu1 %v1068_v38, %s1008_s1 }
  0xaf   :  { %809 = vmatmul.msk.bf16.vlgmr.msra.gmra.mxu2 %vm180_vm1, %v1066_v37 }
  0xb6   :  { %343 = vrot.lane.b32.xlu2 %v1062_v30, %s1012_s6  ;;  %345 = vrot.lane.b32.xlu1 %v1062_v30, %s1011_s2 }
  0xbe   :  { %486 = vrot.lane.b32.xlu2 %v1062_v30, %s1013_s7  ;;  %366 = vrot.lane.b32.xlu1 %v1068_v38, %s1012_s6 }
  0xc6   :  { %484 = vrot.lane.b32.xlu1 %v1062_v30, %s1014_s8  ;;  %316 = vrot.lane.b32.xlu2 %v1066_v37, %s1012_s6 }
  0xce   :  { %457 = vrot.lane.b32.xlu1 %v1066_v37, %s1014_s8 }
 0x108   :  { %v369_v40 = vpop.permute.xlu2 %368 }
 0x109   :  { %v374_v55 = vsel %vm180_vm1, %v369_v40, 0 }
 0x110   :  { %v344_v41 = vpop.permute.xlu2 %343 }
 0x118   :  { %v203_v42 = vpop.permute.xlu0 %202  ;;  %v1085_v43 = vpop.permute.xlu2 %486 }
 0x119   :  { %v208_v44 = vsel %vm180_vm1, %v203_v42, 0 }
 0x11a   :  { %217 = vmatpush.bf16.xpose.msra.mxu3 %v208_v44 }
 0x120   :  { %v226_v45 = vpop.permute.xlu1 %225  ;;  %v317_v46 = vpop.permute.xlu2 %316 }
 0x121   :  { %810 = vmatmul.msk.bf16.vlgmr.msra.gmra.mxu3 %vm180_vm1, %v153_v28  ;;  %818 = vmatmul.msk.bf16.vlgmr.msrb.gmra.mxu1 %vm180_vm1, %v317_v46  ;;  %v231_v47 = vsel %vm180_vm1, %v226_v45, 0 }
 0x122   :  { %240 = vmatpush.bf16.xpose.msrb.mxu2 %v231_v47 }
 0x128   :  { %v346_v49 = vpop.permute.xlu1 %345 }
 0x129   :  { %v351_v50 = vsel %vm180_vm1, %v346_v49, 0  ;;  %811 = vmatmul.msk.bf16.vlgmr.msrb.gmra.mxu2 %vm180_vm1, %v154_v33 }
 0x12a   :  { %360 = vmatpush.bf16.xpose.msra.mxu2 %v351_v50 }
 0x130   :  { %v1093_v53 = vpop.permute.xlu1 %366 }
 0x132   :  { %475 = vmatpush.bf16.msrb.mxu2 %v852_v48  ;;  %v193_v51 = vpop.f32.mrf.mxu2 }
 0x133   :  { %v198_v52 = vpack.c.bf16 %v193_v51, %v193_v51 }
 0x135   :  { %v278_v54 = vsel %vm276_vm2, %v198_v52, 0 }
 0x136   :  { %287 = vmatpush.bf16.msrb.mxu3 %v278_v54 }
 0x138   :  { %v1099_v59 = vpop.permute.xlu1 %484 }
 0x139   :  { %819 = vmatmul.msk.bf16.vlgmr.msra.gmra.mxu2 %vm180_vm1, %v344_v41 }
 0x13a   :  { %383 = vmatpush.bf16.xpose.msra.mxu3 %v374_v55  ;;  %v195_v56 = vpop.f32.mrf.mxu2 }
 0x13b   :  { %v199_v57 = vpack.c.bf16 %v195_v56, %v195_v56 }
 0x13d   :  { %v297_v58 = vsel %vm276_vm2, %v199_v57, 0 }
 0x13e   :  { %306 = vmatpush.bf16.msrb.mxu0 %v297_v58 }
 0x140   :  { %v458_v60 = vpop.permute.xlu1 %457 }
 0x149   :  { %827 = vmatmul.msk.bf16.vlgmr.msrb.gmra.mxu2 %vm180_vm1, %v458_v60 }
 0x19e   :  { %v336_v0 = vpop.f32.mrf.mxu1 }
 0x19f   :  { %v341_v1 = vpack.c.bf16 %v336_v0, %v336_v0 }
 0x1a1   :  { %v419_v2 = vsel %vm276_vm2, %v341_v1, 0 }
 0x1a2   :  { %428 = vmatpush.bf16.msra.mxu0 %v419_v2 }
 0x1a4   :  { %v219_v3 = vpop.f32.mrf.mxu3 }
 0x1a5   :  { %v246_v6 = vmul.f32 0.25, %v219_v3 }
 0x1a6   :  { %v338_v7 = vpop.f32.mrf.mxu1 }
 0x1a7   :  { %v342_v8 = vpack.c.bf16 %v338_v7, %v338_v7  ;;  %v248_v9 = vadd.f32 %v246_v6, %v1103_v5 }
 0x1a9   :  { %v438_v10 = vsel %vm276_vm2, %v342_v8, 0  ;;  %v251_v11 = vsel %vm250_vm4, %v248_v9, -inf }
 0x1aa   :  { %252 = vmax.xlane.f32.xlu0 %v251_v11  ;;  %447 = vmatpush.bf16.msra.mxu1 %v438_v10 }
 0x1ac   :  { %v221_v12 = vpop.f32.mrf.mxu3  ;;  %v242_v13 = vpop.f32.mrf.mxu2 }
 0x1ad   :  { %v247_v14 = vmul.f32 0.25, %v242_v13 }
 0x1af   :  { %v249_v15 = vadd.f32 %v247_v14, %v1103_v5 }
 0x1b1   :  { %v254_v16 = vsel %vm250_vm4, %v249_v15, -inf }
 0x1b2   :  { %255 = vmax.xlane.f32.xlu2 %v254_v16 }
 0x1b4   :  { %v244_v17 = vpop.f32.mrf.mxu2 }
 0x1bc   :  { %v362_v18 = vpop.f32.mrf.mxu2 }
 0x1bd   :  { %v389_v19 = vmul.f32 0.25, %v362_v18 }
 0x1be   :  { %509 = vrot.lane.b32.xlu0 %v1068_v38, %s1013_s7 }
 0x1bf   :  { %v391_v20 = vadd.f32 %v389_v19, %v1103_v5 }
 0x1c1   :  { %v393_v21 = vsel %vm250_vm4, %v391_v20, -inf }
 0x1c2   :  { %394 = vmax.xlane.f32.xlu1 %v393_v21 }
 0x1c4   :  { %v364_v22 = vpop.f32.mrf.mxu2 }
 0x1c6   :  { %650 = vrot.lane.b32.xlu0 %v1068_v38, %s1016_s9 }
 0x1ca   :  { %507 = vrot.lane.b32.xlu2 %v1068_v38, %s1014_s8 }
 0x1cc   :  { %v477_v23 = vpop.f32.mrf.mxu2 }
 0x1cd   :  { %v482_v24 = vpack.c.bf16 %v477_v23, %v477_v23 }
 0x1cf   :  { %v560_v25 = vsel %vm276_vm2, %v482_v24, 0 }
 0x1d0   :  { %569 = vmatpush.bf16.msrb.mxu1 %v560_v25 }
 0x1d2   :  { %648 = vrot.lane.b32.xlu2 %v1068_v38, %s1017_s10  ;;  %v492_v38 = vsel %vm180_vm1, %v1085_v43, 0 }
 0x1d4   :  { %v479_v26 = vpop.f32.mrf.mxu2 }
 0x1d5   :  { %v483_v27 = vpack.c.bf16 %v479_v26, %v479_v26 }
 0x1d7   :  { %v579_v28 = vsel %vm276_vm2, %v483_v27, 0 }
 0x1d8   :  { %588 = vmatpush.bf16.msra.mxu2 %v579_v28 }
 0x1db   :  { %627 = vrot.lane.b32.xlu1 %v1062_v30, %s1016_s9 }
 0x21d   :  { %v253_v29 = vpop.xlane.xlu0 %252 }
 0x21e   :  { %v257_v31 = vsub.f32 %v248_v9, %v253_v29 }
 0x220   :  { %v259_v32 = vmul.f32 1.442695, %v257_v31 }
 0x222   :  { %870 = vpow2.f32 %v259_v32 }
 0x225   :  { %v256_v33 = vpop.xlane.xlu2 %255 }
 0x226   :  { %v258_v34 = vsub.f32 %v249_v15, %v256_v33  ;;  %v853_v15 = vld [vmem:[#allocation7 + $0x18] sm:$0xff] }
 0x228   :  { %v871_v35 = vpop.eup %870  ;;  %v261_v36 = vmul.f32 1.442695, %v258_v34 }
 0x229   :  { %v271_v39 = vpack.c.bf16 %v871_v35, %v871_v35  ;;  %v263_v10 = vsel %vm250_vm4, %v871_v35, 0.0 }
 0x22a   :  { %872 = vpow2.f32 %v261_v36 }
 0x22b   :  { %812 = vmatmul.msk.bf16.vlgmr.msrb.gmra.mxu3 %vm250_vm4, %v271_v39 }
 0x22c   :  { %501 = vmatpush.bf16.xpose.msrb.mxu3 %v492_v38 }
 0x22d   :  { %v508_v51 = vpop.permute.xlu2 %507 }
 0x230   :  { %v1125_v40 = vpop.eup %872  ;;  %v510_v41 = vpop.permute.xlu0 %509 }
 0x231   :  { %v515_v42 = vsel %vm180_vm1, %v510_v41, 0  ;;  %v272_v44 = vpack.c.bf16 %v1125_v40, %v1125_v40 }
 0x233   :  { %813 = vmatmul.msk.bf16.vlgmr.msrb.gmra.mxu0 %vm250_vm4, %v272_v44 }
 0x234   :  { %524 = vmatpush.bf16.xpose.msrb.mxu0 %v515_v42 }
 0x235   :  { %v395_v45 = vpop.xlane.xlu1 %394  ;;  %v649_v16 = vpop.permute.xlu2 %648 }
 0x236   :  { %v399_v46 = vsub.f32 %v391_v20, %v395_v45 }
 0x238   :  { %v401_v47 = vmul.f32 1.442695, %v399_v46  ;;  %v651_v11 = vpop.permute.xlu0 %650 }
 0x239   :  { %v656_v20 = vsel %vm180_vm1, %v651_v11, 0 }
 0x23a   :  { %874 = vpow2.f32 %v401_v47 }
 0x23b   :  { %820 = vmatmul.msk.bf16.vlgmr.msra.gmra.mxu3 %vm180_vm1, %v1093_v53 }
 0x23c   :  { %616 = vmatpush.bf16.msra.mxu3 %v853_v15 }
 0x240   :  { %v1133_v43 = vpop.eup %874 }
 0x241   :  { %v413_v48 = vpack.c.bf16 %v1133_v43, %v1133_v43 }
 0x243   :  { %821 = vmatmul.msk.bf16.vlgmr.msra.gmra.mxu0 %vm250_vm4, %v413_v48  ;;  %v266_v48 = vsel %vm250_vm4, %v1125_v40, 0.0  ;;  %v405_v40 = vsel %vm250_vm4, %v1133_v43, 0.0 }
 0x24b   :  { %828 = vmatmul.msk.bf16.vlgmr.msrb.gmra.mxu3 %vm180_vm1, %v1099_v59 }
 0x24d   :  { %v628_v49 = vpop.permute.xlu1 %627 }
 0x24e   :  { %v633_v50 = vsel %vm180_vm1, %v628_v49, 0 }
 0x24f   :  { %642 = vmatpush.bf16.xpose.msra.mxu0 %v633_v50 }
 0x253   :  { %829 = vmatmul.msk.bf16.vlgmr.msrb.gmra.mxu0 %vm180_vm1, %v508_v51 }
 0x2ae   :  { %v1142_v52 = vpop.f32.mrf.mxu3 }
 0x2b0   :  { %v1144_v53 = vpop.f32.mrf.mxu0 }
 0x2b6   :  { %v291_v54 = vpop.f32.mrf.mxu3 }
 0x2b8   :  { %v310_v55 = vpop.f32.mrf.mxu0 }
 0x2be   :  { %v385_v56 = vpop.f32.mrf.mxu3 }
 0x2bf   :  { %v390_v57 = vmul.f32 0.25, %v385_v56 }
 0x2c0   :  { %v1146_v58 = vpop.f32.mrf.mxu0 }
 0x2c1   :  { %v392_v60 = vadd.f32 %v390_v57, %v1103_v5 }
 0x2c3   :  { %v396_v59 = vsel %vm250_vm4, %v392_v60, -inf }
 0x2c4   :  { %397 = vmax.xlane.f32.xlu0 %v396_v59 }
 0x2c6   :  { %v387_v61 = vpop.f32.mrf.mxu3 }
 0x2c8   :  { %v432_v62 = vpop.f32.mrf.mxu0 }
 0x2ce   :  { %v503_v63 = vpop.f32.mrf.mxu3 }
 0x2cf   :  { %v530_v0 = vmul.f32 0.25, %v503_v63 }
 0x2d0   :  { %v526_v1 = vpop.f32.mrf.mxu0 }
 0x2d1   :  { %v531_v2 = vmul.f32 0.25, %v526_v1  ;;  %v532_v3 = vadd.f32 %v530_v0, %v1103_v5 }
 0x2d3   :  { %v534_v4 = vsel %vm250_vm4, %v532_v3, -inf  ;;  %v533_v6 = vadd.f32 %v531_v2, %v1103_v5 }
 0x2d4   :  { %535 = vmax.xlane.f32.xlu0 %v534_v4 }
 0x2d5   :  { %v537_v7 = vsel %vm250_vm4, %v533_v6, -inf }
 0x2d6   :  { %v505_v8 = vpop.f32.mrf.mxu3  ;;  %538 = vmax.xlane.f32.xlu2 %v537_v7 }
 0x2d8   :  { %v528_v9 = vpop.f32.mrf.mxu0 }
 0x2de   :  { %264 = vadd.xlane.f32.xlu2 %v263_v10 }
 0x2e8   :  { %625 = vrot.lane.b32.xlu0 %v1062_v30, %s1017_s10 }
 0x2f0   :  { %598 = vrot.lane.b32.xlu0 %v1066_v37, %s1017_s10 }
 0x337   :  { %v398_v12 = vpop.xlane.xlu0 %397 }
 0x338   :  { %v400_v13 = vsub.f32 %v392_v60, %v398_v12 }
 0x33a   :  { %v403_v14 = vmul.f32 1.442695, %v400_v13 }
 0x33c   :  { %876 = vpow2.f32 %v403_v14 }
 0x342   :  { %v877_v17 = vpop.eup %876 }
 0x343   :  { %v414_v18 = vpack.c.bf16 %v877_v17, %v877_v17  ;;  %v408_v19 = vsel %vm250_vm4, %v877_v17, 0.0 }
 0x344   :  { %409 = vadd.xlane.f32.xlu2 %v408_v19 }
 0x345   :  { %822 = vmatmul.msk.bf16.vlgmr.msra.gmra.mxu1 %vm250_vm4, %v414_v18 }
 0x346   :  { %665 = vmatpush.bf16.xpose.msra.mxu1 %v656_v20 }
 0x347   :  { %v536_v30 = vpop.xlane.xlu0 %535 }
 0x348   :  { %v540_v37 = vsub.f32 %v532_v3, %v536_v30 }
 0x349   :  { %v539_v21 = vpop.xlane.xlu2 %538 }
 0x34a   :  { %v542_v22 = vmul.f32 1.442695, %v540_v37  ;;  %v541_v23 = vsub.f32 %v533_v6, %v539_v21 }
 0x34c   :  { %878 = vpow2.f32 %v542_v22  ;;  %v544_v24 = vmul.f32 1.442695, %v541_v23 }
 0x34e   :  { %880 = vpow2.f32 %v544_v24 }
 0x351   :  { %v265_v10 = vpop.xlane.xlu2 %264 }
 0x352   :  { %v879_v25 = vpop.eup %878 }
 0x353   :  { %v554_v26 = vpack.c.bf16 %v879_v25, %v879_v25  ;;  %v546_v57 = vsel %vm250_vm4, %v879_v25, 0.0 }
 0x354   :  { %v881_v27 = vpop.eup %880 }
 0x355   :  { %v555_v28 = vpack.c.bf16 %v881_v27, %v881_v27  ;;  %830 = vmatmul.msk.bf16.vlgmr.msrb.gmra.mxu1 %vm250_vm4, %v554_v26  ;;  %v549_v61 = vsel %vm250_vm4, %v881_v27, 0.0 }
 0x357   :  { %831 = vmatmul.msk.bf16.vlgmr.msra.gmra.mxu2 %vm250_vm4, %v555_v28 }
 0x35a   :  { %v626_v29 = vpop.permute.xlu0 %625 }
 0x35b   :  { %837 = vmatmul.msk.bf16.vlgmr.msra.gmra.mxu0 %vm180_vm1, %v626_v29 }
 0x362   :  { %v599_v31 = vpop.permute.xlu0 %598 }
 0x363   :  { %836 = vmatmul.msk.bf16.vlgmr.msra.gmra.mxu3 %vm180_vm1, %v599_v31 }
 0x365   :  { %838 = vmatmul.msk.bf16.vlgmr.msra.gmra.mxu1 %vm180_vm1, %v649_v16 }
 0x3b7   :  { %v410_v13 = vpop.xlane.xlu2 %409 }
 0x3c2   :  { %v1167_v32 = vpop.f32.mrf.mxu1 }
 0x3ca   :  { %v451_v33 = vpop.f32.mrf.mxu1 }
 0x3d2   :  { %v1169_v34 = vpop.f32.mrf.mxu1 }
 0x3d8   :  { %v644_v35 = vpop.f32.mrf.mxu0 }
 0x3d9   :  { %v671_v36 = vmul.f32 0.25, %v644_v35 }
 0x3da   :  { %v573_v39 = vpop.f32.mrf.mxu1  ;;  %v1171_v38 = vpop.f32.mrf.mxu2 }
 0x3db   :  { %v673_v41 = vadd.f32 %v671_v36, %v1103_v5 }
 0x3dd   :  { %v675_v42 = vsel %vm250_vm4, %v673_v41, -inf }
 0x3de   :  { %676 = vmax.xlane.f32.xlu1 %v675_v42 }
 0x3e0   :  { %v646_v44 = vpop.f32.mrf.mxu0 }
 0x3e2   :  { %v592_v45 = vpop.f32.mrf.mxu2  ;;  %v667_v46 = vpop.f32.mrf.mxu1 }
 0x3e3   :  { %v672_v47 = vmul.f32 0.25, %v667_v46 }
 0x3e5   :  { %v674_v49 = vadd.f32 %v672_v47, %v1103_v5 }
 0x3e6   :  { %v618_v50 = vpop.f32.mrf.mxu3  ;;  %267 = vadd.xlane.f32.xlu1 %v266_v48 }
 0x3e7   :  { %v623_v51 = vpack.c.bf16 %v618_v50, %v618_v50  ;;  %v678_v54 = vsel %vm250_vm4, %v674_v49, -inf }
 0x3e8   :  { %679 = vmax.xlane.f32.xlu0 %v678_v54 }
 0x3e9   :  { %v701_v55 = vsel %vm276_vm2, %v623_v51, 0 }
 0x3ea   :  { %v669_v56 = vpop.f32.mrf.mxu1  ;;  %710 = vmatpush.bf16.msrb.mxu2 %v701_v55 }
 0x3ee   :  { %v620_v60 = vpop.f32.mrf.mxu3  ;;  %547 = vadd.xlane.f32.xlu1 %v546_v57 }
 0x3ef   :  { %v624_v59 = vpack.c.bf16 %v620_v60, %v620_v60 }
 0x3f0   :  { %406 = vadd.xlane.f32.xlu0 %v405_v40 }
 0x3f1   :  { %v720_v5 = vsel %vm276_vm2, %v624_v59, 0 }
 0x3f2   :  { %729 = vmatpush.bf16.msrb.mxu3 %v720_v5 }
 0x3f8   :  { %550 = vadd.xlane.f32.xlu0 %v549_v61 }
 0x451   :  { %v677_v62 = vpop.xlane.xlu1 %676 }
 0x452   :  { %v681_v63 = vsub.f32 %v673_v41, %v677_v62 }
 0x454   :  { %v683_v0 = vmul.f32 1.442695, %v681_v63 }
 0x456   :  { %882 = vpow2.f32 %v683_v0 }
 0x459   :  { %v268_v11 = vpop.xlane.xlu1 %267 }
 0x45b   :  { %v680_v1 = vpop.xlane.xlu0 %679 }
 0x45c   :  { %v883_v2 = vpop.eup %882  ;;  %v682_v3 = vsub.f32 %v674_v49, %v680_v1 }
 0x45d   :  { %v695_v4 = vpack.c.bf16 %v883_v2, %v883_v2  ;;  %v687_v6 = vsel %vm250_vm4, %v883_v2, 0.0 }
 0x45e   :  { %v685_v7 = vmul.f32 1.442695, %v682_v3  ;;  %688 = vadd.xlane.f32.xlu2 %v687_v6 }
 0x45f   :  { %839 = vmatmul.msk.bf16.vlgmr.msrb.gmra.mxu2 %vm250_vm4, %v695_v4 }
 0x460   :  { %884 = vpow2.f32 %v685_v7 }
 0x461   :  { %v548_v14 = vpop.xlane.xlu1 %547 }
 0x463   :  { %v407_v12 = vpop.xlane.xlu0 %406 }
 0x464   :  { %886 = vrcp.f32 %v407_v12 }
 0x465   :  { %888 = vrcp.f32 %v265_v10 }
 0x466   :  { %v885_v43 = vpop.eup %884  ;;  %890 = vrcp.f32 %v548_v14 }
 0x467   :  { %v696_v8 = vpack.c.bf16 %v885_v43, %v885_v43  ;;  %v690_v9 = vsel %vm250_vm4, %v885_v43, 0.0 }
 0x468   :  { %691 = vadd.xlane.f32.xlu1 %v690_v9 }
 0x469   :  { %840 = vmatmul.msk.bf16.vlgmr.msrb.gmra.mxu3 %vm250_vm4, %v696_v8 }
 0x46a   :  { %v887_v15 = vpop.eup %886 }
 0x46b   :  { %v889_v17 = vpop.eup %888  ;;  %v453_v18 = vmul.f32 %v887_v15, %v1146_v58  ;;  %v551_v20 = vpop.xlane.xlu0 %550  ;;  %v869_v58 = vld [vmem:[%s1209_s3] ss:$0 sm:$0xff]  ;;  %s1018_s3 = smov [#allocation8]  }
 0x46c   :  { %v312_v19 = vmul.f32 %v889_v17, %v1142_v52  ;;  %v891_v30 = vpop.eup %890  ;;  %s751_s13 = sshll.u32 %s1018_s3, 4  ;;  %s752_s13 = int_to_ptr.vmem [resolvable:$true] %s751_s13 }
 0x46d   :  { %v594_v21 = vmul.f32 %v891_v30, %v1169_v34 }
 0x46e   :  { %v455_v37 = vadd.f32 %v453_v18, %v312_v19 }
 0x470   :  { %v596_v25 = vadd.f32 %v594_v21, %v455_v37 }
 0x4d1   :  { %v689_v16 = vpop.xlane.xlu2 %688 }
 0x4d2   :  { %892 = vrcp.f32 %v689_v16 }
 0x4d3   :  { %894 = vrcp.f32 %v268_v11 }
 0x4d4   :  { %896 = vrcp.f32 %v551_v20 }
 0x4d5   :  { %898 = vrcp.f32 %v410_v13 }
 0x4d8   :  { %v893_v22 = vpop.eup %892 }
 0x4d9   :  { %v895_v27 = vpop.eup %894 }
 0x4da   :  { %v897_v52 = vpop.eup %896  ;;  %v313_v29 = vmul.f32 %v895_v27, %v1144_v53 }
 0x4db   :  { %v692_v24 = vpop.xlane.xlu1 %691  ;;  %v899_v33 = vpop.eup %898  ;;  %v595_v35 = vmul.f32 %v897_v52, %v1171_v38 }
 0x4dc   :  { %900 = vrcp.f32 %v692_v24  ;;  %v454_v34 = vmul.f32 %v899_v33, %v1167_v32 }
 0x4de   :  { %v456_v39 = vadd.f32 %v454_v34, %v313_v29 }
 0x4e0   :  { %v597_v44 = vadd.f32 %v595_v35, %v456_v39 }
 0x4e2   :  { %v712_v23 = vpop.f32.mrf.mxu2  ;;  %v901_v41 = vpop.eup %900 }
 0x4e3   :  { %v735_v26 = vmul.f32 %v893_v22, %v712_v23 }
 0x4e5   :  { %v737_v28 = vadd.f32 %v735_v26, %v596_v25 }
 0x4e7   :  { %v743_v31 = vadd.f32 %v869_v58, %v737_v28 }
 0x4e9   :  { %745 = vst.msk [vmem:[#allocation8] sm:$0xff] %vm121_vm0, %v743_v31 }
 0x4ea   :  { %v714_v36 = vpop.f32.mrf.mxu2 }
 0x4ec   :  { %v731_v42 = vpop.f32.mrf.mxu3 }
 0x4ed   :  { %v736_v45 = vmul.f32 %v901_v41, %v731_v42 }
 0x4ef   :  { %v738_v53 = vadd.f32 %v736_v45, %v597_v44 }
 0x4f1   :  { %v744_v46 = vadd.f32 %v869_v58, %v738_v53 }
 0x4f3   :  { %746 = vst.msk [vmem:[#allocation8 + $0x8] sm:$0xff] %vm121_vm0, %v744_v46 }
 0x4f4   :  { %v733_v32 = vpop.f32.mrf.mxu3  ;;  %759 = dma.vmem_to_hbm [thread:$0]  %s752_s13, 256, %s754_s16, [#allocation4], %s1005_s23, %s1005_s23, %s1006_s24  }
 0x4f5   :  { %1002 = dma.done.wait [#allocation4], 256  }
 0x4f6   :  { %1003 = vsyncadd [#allocation4], 4294967040 }
 0x4f7   :  { %764 = vsyncpa [#allocation3], 1 }
 0x4f8   :  { %765 = vsyncpa [#allocation6], 1 }
 0x4f9   :  { %766 = vsyncpa [#allocation4], 1 }

</bundles_post_ra>
